<compile_context>
chip_gen: v5e
topology: v5e:2x2
jax: 0.10.0
libtpu: 0.0.40
codegen_flags: <defaults>
</compile_context>

<pallas_src>
import math

import jax
import jax.numpy as jnp
from jax import lax
from jax.experimental import pallas as pl
from jax.experimental.pallas import tpu as pltpu


# ------------------------------ Pallas kernel -------------------------------


def _circuit_kernel(gates_ref, x_ref, out_ref):
    """One grid step = one batch tile x one chunk of gates.

    gates_ref : (g_blk, 2*dim, 2*dim) packed real block matrices
    x_ref     : (bt, 2*dim)           packed [re | im] input state
    out_ref   : (bt, 2*dim)           packed state; VMEM-resident accumulator
                                      across the gate-chunk grid axis.
    """
    gc = pl.program_id(1)

    @pl.when(gc == 0)
    def _init():
        out_ref[...] = x_ref[...]

    s = out_ref[...]
    # Statically unrolled in-kernel gate loop: one big region for the scheduler
    # instead of one grid step per gate.  Each gate is a single plain MXU
    # matmul (B, 2*dim) x (2*dim, 2*dim) with f32 accumulation.
    for g in range(gates_ref.shape[0]):
        s = jnp.dot(s, gates_ref[g], preferred_element_type=jnp.float32)
    out_ref[...] = s


# ------------------------------ Host wrapper --------------------------------


def _pack_gate_matrix(m):
    """(dim, dim) complex gate M -> (2*dim, 2*dim) real block matrix W with
    [re | im] @ W == [re' | im'] for  out = M @ state  (i.e. state @ M.T)."""
    mt = jnp.transpose(m).astype(jnp.complex64)
    mr = jnp.real(mt).astype(jnp.float32)
    mi = jnp.imag(mt).astype(jnp.float32)
    top = jnp.concatenate([mr, mi], axis=1)     # (dim, 2*dim)
    bot = jnp.concatenate([-mi, mr], axis=1)    # (dim, 2*dim)
    return jnp.concatenate([top, bot], axis=0)  # (2*dim, 2*dim)


def quantum_circuit_apply(gate_matrices, state, *, max_gate_block_bytes=8 << 20):
    """Apply a sequence of (dim, dim) complex gate matrices to (B, dim) states.

    The full gate sequence runs inside one pallas_call; the state never leaves
    VMEM between gates.  Returns a complex64 (B, dim) array.
    """
    b, dim = state.shape
    num_gates = len(gate_matrices)
    assert num_gates >= 1
    for m in gate_matrices:
        assert m.shape == (dim, dim)
    d2 = 2 * dim

    # All gates packed into one (G, 2*dim, 2*dim) real stack: one input, one
    # DMA stream, one MXU matmul per gate.
    packed = jnp.stack([_pack_gate_matrix(m) for m in gate_matrices])

    # Gate chunking: whole circuit in one chunk when it fits comfortably in
    # VMEM; otherwise stream chunks along an "arbitrary" grid axis with the
    # state held resident in the output block.
    bytes_per_gate = 4 * d2 * d2
    g_blk = int(max(1, min(num_gates, max_gate_block_bytes // bytes_per_gate)))
    n_chunks = pl.cdiv(num_gates, g_blk)
    pad = n_chunks * g_blk - num_gates
    if pad:
        ident = jnp.eye(d2, dtype=jnp.float32)[None]
        packed = jnp.concatenate([packed, jnp.tile(ident, (pad, 1, 1))], axis=0)
    # TODO(synk): for dim >= 2048 a single packed gate (>= 64 MiB) no longer
    # double-buffers in v7x's 64 MiB VMEM; that regime needs N/K tiling of the
    # gate matrix with an inner accumulation loop.

    # Batch tiling: tiny batches run as one tile; large batches get a
    # "parallel" grid axis (second TensorCore on v7x).
    if b > 256 and b % 8 == 0:
        bt = next(c for c in (256, 128, 64, 32, 16, 8) if b % c == 0)
    else:
        bt = b
    n_bt = b // bt

    # Packed real state [re | im].
    if jnp.iscomplexobj(state):
        sr = jnp.real(state).astype(jnp.float32)
        si = jnp.imag(state).astype(jnp.float32)
    else:
        sr = state.astype(jnp.float32)
        si = jnp.zeros_like(sr)
    x_packed = jnp.concatenate([sr, si], axis=-1)  # (B, 2*dim)

    # VMEM guard: gate chunk (double-buffered) + in/out state tiles.  Clamp the
    # requested limit against the device's actual VMEM capacity (64 MiB on v7x).
    vmem_needed = 2 * g_blk * bytes_per_gate + 4 * (4 * bt * d2)
    vmem_limit = None
    if vmem_needed > (30 << 20):
        try:
            vmem_cap = pltpu.get_tpu_info().vmem_capacity_bytes
        except Exception:
            vmem_cap = 64 << 20  # conservative: v7x per-TensorCore VMEM
        vmem_limit = min(int(vmem_needed * 1.25), int(vmem_cap * 0.85))

    total_gates = n_chunks * g_blk
    cost = pl.CostEstimate(
        flops=2 * total_gates * b * d2 * d2,
        transcendentals=0,
        bytes_accessed=4 * (n_bt * total_gates * d2 * d2 + 2 * b * d2),
    )

    out_packed = pl.pallas_call(
        _circuit_kernel,
        out_shape=jax.ShapeDtypeStruct((b, d2), jnp.float32),
        grid=(n_bt, n_chunks),
        in_specs=[
            pl.BlockSpec((g_blk, d2, d2), lambda i, c: (c, 0, 0)),   # gate chunk
            pl.BlockSpec((bt, d2), lambda i, c: (i, 0)),             # input state
        ],
        out_specs=pl.BlockSpec((bt, d2), lambda i, c: (i, 0)),       # resident state
        compiler_params=pltpu.CompilerParams(
            # Batch tiles are independent; gate chunks carry the state.
            dimension_semantics=("parallel", "arbitrary"),
            vmem_limit_bytes=vmem_limit,
        ),
        cost_estimate=cost,
    )(packed, x_packed)

    return lax.complex(out_packed[:, :dim], out_packed[:, dim:])


# ------------------------ Gate matrices (get_matrix) -------------------------


def _kron_pow(m, n):
    out = m
    for _ in range(n - 1):
        out = jnp.kron(out, m)
    return out


def hadamard_matrix(num_qubits):
    h = jnp.array([[1.0, 1.0], [1.0, -1.0]], dtype=jnp.complex64) / math.sqrt(2.0)
    return _kron_pow(h, num_qubits)


def phase_matrix(num_qubits, phase=math.pi / 4):
    e = jnp.asarray(math.cos(phase) + 1j * math.sin(phase), dtype=jnp.complex64)
    p = jnp.array([[1.0, 0.0], [0.0, 0.0]], dtype=jnp.complex64)
    p = p.at[1, 1].set(e)
    return _kron_pow(p, num_qubits)


def controlled_matrix(num_qubits, target_matrix):
    eye2 = jnp.eye(2, dtype=jnp.complex64)
    p0 = jnp.array([[1.0, 0.0], [0.0, 0.0]], dtype=jnp.complex64)
    p1 = jnp.array([[0.0, 0.0], [0.0, 1.0]], dtype=jnp.complex64)
    m = jnp.kron(p0, eye2) + jnp.kron(p1, target_matrix.astype(jnp.complex64))
    for _ in range(num_qubits - 2):
        m = jnp.kron(m, eye2)
    return m


def build_circuit_matrices(num_qubits, depth, phase=math.pi / 4):
    """One layer = [Hadamard, Phase, Controlled-Phase], repeated `depth` times."""
    h = hadamard_matrix(num_qubits)
    p = phase_matrix(num_qubits, phase)
    c = controlled_matrix(num_qubits, phase_matrix(1, phase))
    gates = []
    for _ in range(depth):
        gates.extend([h, p, c])
    return gates


def reference_circuit(gate_matrices, state):
    """Pure-JAX reference matching torch.matmul(M, s.unsqueeze(-1)).squeeze(-1)."""
    s = state.astype(jnp.complex64)
    for m in gate_matrices:
        s = jnp.matmul(m, s[..., None])[..., 0]
    return s


if __name__ == "__main__":
    num_qubits = 7            # dim = 128 -> packed K = N = 256 (fills 256x256 MXU)
    depth = 2                 # 2 layers x 3 gates = 6 fused gate applications
    batch = 8
    dim = 2 ** num_qubits

    key = jax.random.PRNGKey(0)
    x = jax.random.normal(key, (batch, dim), dtype=jnp.float32)

    gates = build_circuit_matrices(num_qubits, depth)

    out = quantum_circuit_apply(gates, x)
    out = jax.block_until_ready(out)

    ref = reference_circuit(gates, x)
    assert out.shape == (batch, dim)
    assert out.dtype == jnp.complex64
    assert jnp.allclose(out, ref, atol=1e-3, rtol=1e-3), float(
        jnp.max(jnp.abs(out - ref)))

    print("KERNEL_OK")
</pallas_src>

<mosaic_0001>
module attributes {stable_mosaic.version = 11 : i64} {
  func.func @_circuit_kernel(%arg0: i32, %arg1: i32, %arg2: memref<6x256x256xf32, #tpu.memory_space<vmem>>, %arg3: memref<8x256xf32, #tpu.memory_space<vmem>>, %arg4: memref<8x256xf32, #tpu.memory_space<vmem>>) attributes {dimension_semantics = [#tpu.dimension_semantics<parallel>, #tpu.dimension_semantics<arbitrary>], iteration_bounds = array<i64: 1, 1>, scalar_prefetch = 0 : i64, scratch_operands = 0 : i64, tpu.core_type = #tpu.core_type<tc>, window_params = [{transform_indices = @transform_0, window_bounds = array<i64: 6, 256, 256>}, {transform_indices = @transform_1, window_bounds = array<i64: 8, 256>}, {transform_indices = @transform_2, window_bounds = array<i64: 8, 256>}]} {
    %c0_i32 = arith.constant 0 : i32
    %0 = arith.cmpi eq, %arg1, %c0_i32 : i32
    %1 = arith.extui %0 : i1 to i32
    %c0_i32_0 = arith.constant 0 : i32
    %2 = arith.cmpi ne, %1, %c0_i32_0 : i32
    scf.if %2 {
      %c0_22 = arith.constant 0 : index
      %c0_23 = arith.constant 0 : index
      %23 = vector.load %arg3[%c0_22, %c0_23] : memref<8x256xf32, #tpu.memory_space<vmem>>, vector<8x256xf32>
      %c0_24 = arith.constant 0 : index
      %c0_25 = arith.constant 0 : index
      %24 = vector.load %arg4[%c0_24, %c0_25] : memref<8x256xf32, #tpu.memory_space<vmem>>, vector<8x256xf32>
      tpu.vector_store %arg4[%c0_24, %c0_25], %23 {strides = array<i32>} : memref<8x256xf32, #tpu.memory_space<vmem>>, vector<8x256xf32>,
    } else {
    }
    %c0 = arith.constant 0 : index
    %c0_1 = arith.constant 0 : index
    %3 = vector.load %arg4[%c0, %c0_1] : memref<8x256xf32, #tpu.memory_space<vmem>>, vector<8x256xf32>
    %c0_2 = arith.constant 0 : index
    %c0_3 = arith.constant 0 : index
    %c0_4 = arith.constant 0 : index
    %4 = vector.load %arg2[%c0_2, %c0_3, %c0_4] : memref<6x256x256xf32, #tpu.memory_space<vmem>>, vector<1x256x256xf32>
    %5 = vector.shape_cast %4 : vector<1x256x256xf32> to vector<256x256xf32>
    %cst = arith.constant dense<0.000000e+00> : vector<8x256xf32>
    %6 = tpu.matmul %3, %5, %cst {dimension_numbers = #tpu.dot_dimension_numbers<[1], [0], [0], [1], [0, 0, 1, 1], [], []>} : vector<8x256xf32>, vector<256x256xf32>, vector<8x256xf32> -> vector<8x256xf32>
    %c1 = arith.constant 1 : index
    %c0_5 = arith.constant 0 : index
    %c0_6 = arith.constant 0 : index
    %7 = vector.load %arg2[%c1, %c0_5, %c0_6] : memref<6x256x256xf32, #tpu.memory_space<vmem>>, vector<1x256x256xf32>
    %8 = vector.shape_cast %7 : vector<1x256x256xf32> to vector<256x256xf32>
    %cst_7 = arith.constant dense<0.000000e+00> : vector<8x256xf32>
    %9 = tpu.matmul %6, %8, %cst_7 {dimension_numbers = #tpu.dot_dimension_numbers<[1], [0], [0], [1], [0, 0, 1, 1], [], []>} : vector<8x256xf32>, vector<256x256xf32>, vector<8x256xf32> -> vector<8x256xf32>
    %c2 = arith.constant 2 : index
    %c0_8 = arith.constant 0 : index
    %c0_9 = arith.constant 0 : index
    %10 = vector.load %arg2[%c2, %c0_8, %c0_9] : memref<6x256x256xf32, #tpu.memory_space<vmem>>, vector<1x256x256xf32>
    %11 = vector.shape_cast %10 : vector<1x256x256xf32> to vector<256x256xf32>
    %cst_10 = arith.constant dense<0.000000e+00> : vector<8x256xf32>
    %12 = tpu.matmul %9, %11, %cst_10 {dimension_numbers = #tpu.dot_dimension_numbers<[1], [0], [0], [1], [0, 0, 1, 1], [], []>} : vector<8x256xf32>, vector<256x256xf32>, vector<8x256xf32> -> vector<8x256xf32>
    %c3 = arith.constant 3 : index
    %c0_11 = arith.constant 0 : index
    %c0_12 = arith.constant 0 : index
    %13 = vector.load %arg2[%c3, %c0_11, %c0_12] : memref<6x256x256xf32, #tpu.memory_space<vmem>>, vector<1x256x256xf32>
    %14 = vector.shape_cast %13 : vector<1x256x256xf32> to vector<256x256xf32>
    %cst_13 = arith.constant dense<0.000000e+00> : vector<8x256xf32>
    %15 = tpu.matmul %12, %14, %cst_13 {dimension_numbers = #tpu.dot_dimension_numbers<[1], [0], [0], [1], [0, 0, 1, 1], [], []>} : vector<8x256xf32>, vector<256x256xf32>, vector<8x256xf32> -> vector<8x256xf32>
    %c4 = arith.constant 4 : index
    %c0_14 = arith.constant 0 : index
    %c0_15 = arith.constant 0 : index
    %16 = vector.load %arg2[%c4, %c0_14, %c0_15] : memref<6x256x256xf32, #tpu.memory_space<vmem>>, vector<1x256x256xf32>
    %17 = vector.shape_cast %16 : vector<1x256x256xf32> to vector<256x256xf32>
    %cst_16 = arith.constant dense<0.000000e+00> : vector<8x256xf32>
    %18 = tpu.matmul %15, %17, %cst_16 {dimension_numbers = #tpu.dot_dimension_numbers<[1], [0], [0], [1], [0, 0, 1, 1], [], []>} : vector<8x256xf32>, vector<256x256xf32>, vector<8x256xf32> -> vector<8x256xf32>
    %c5 = arith.constant 5 : index
    %c0_17 = arith.constant 0 : index
    %c0_18 = arith.constant 0 : index
    %19 = vector.load %arg2[%c5, %c0_17, %c0_18] : memref<6x256x256xf32, #tpu.memory_space<vmem>>, vector<1x256x256xf32>
    %20 = vector.shape_cast %19 : vector<1x256x256xf32> to vector<256x256xf32>
    %cst_19 = arith.constant dense<0.000000e+00> : vector<8x256xf32>
    %21 = tpu.matmul %18, %20, %cst_19 {dimension_numbers = #tpu.dot_dimension_numbers<[1], [0], [0], [1], [0, 0, 1, 1], [], []>} : vector<8x256xf32>, vector<256x256xf32>, vector<8x256xf32> -> vector<8x256xf32>
    %c0_20 = arith.constant 0 : index
    %c0_21 = arith.constant 0 : index
    %22 = vector.load %arg4[%c0_20, %c0_21] : memref<8x256xf32, #tpu.memory_space<vmem>>, vector<8x256xf32>
    tpu.vector_store %arg4[%c0_20, %c0_21], %21 {strides = array<i32>} : memref<8x256xf32, #tpu.memory_space<vmem>>, vector<8x256xf32>,
    return
  }
  func.func @transform_0(%arg0: i32, %arg1: i32) -> (i32, i32, i32) {
    %c0_i32 = arith.constant 0 : i32
    %c0_i32_0 = arith.constant 0 : i32
    %c0_i32_1 = arith.constant 0 : i32
    return %arg1, %c0_i32, %c0_i32_0 : i32, i32, i32
  }
  func.func @transform_1(%arg0: i32, %arg1: i32) -> (i32, i32) {
    %c0_i32 = arith.constant 0 : i32
    %c0_i32_0 = arith.constant 0 : i32
    return %arg0, %c0_i32 : i32, i32
  }
  func.func @transform_2(%arg0: i32, %arg1: i32) -> (i32, i32) {
    %c0_i32 = arith.constant 0 : i32
    %c0_i32_0 = arith.constant 0 : i32
    return %arg0, %c0_i32 : i32, i32
  }
}

</mosaic_0001>

<bundles_post_ra>
// kernel: tpu_custom_call.1
= control target key start
LH: loop header
LB: loop body
LE: loop exit
PB: predicated region body
PF: predicated region fallthrough
CT: control target
= control target key end

     0   :  { %7 = vsyncpa [#allocation3], 0  ;;  %s1053_s0 = inlined_call_operand.hbm [shape: f32[6,256,256], index: 0, kind: input, shape index: {}]   ;;  %s1054_s1 = inlined_call_operand.hbm [shape: f32[8,256], index: 1, kind: input, shape index: {}]   ;;  %s1055_s2 = inlined_call_operand.hbm [shape: f32[8,256], index: 2, kind: output, shape index: {}]  }
   0x1   :  { %8 = vsyncpa [#allocation6], 0 }
   0x2   :  { %9 = vsyncpa [#allocation4], 0  ;;  %s14_s11 = sshll.u32 %s1053_s0, 4  ;;  %s1024_s12 = smov [#allocation2]   ;;  %s15_s11 = int_to_ptr.hbm [resolvable:$true] %s14_s11 }
   0x3   :  { %s16_s13 = sshll.u32 %s1024_s12, 4  ;;  %s28_s16 = sshll.u32 %s1054_s1, 4  ;;  %s17_s13 = int_to_ptr.vmem [resolvable:$true] %s16_s13  ;;  %s29_s16 = int_to_ptr.hbm [resolvable:$true] %s28_s16 }
   0x4   :  { %s1025_s17 = smov 256   ;;  %s1026_s18 = smov 16  }
   0x5   :  { %22 = dma.hbm_to_vmem [thread:$0]  %s15_s11, 49152, %s17_s13, [#allocation3], %s1025_s17, %s1025_s17, %s1026_s18  }
   0x6   :  { %s1027_s19 = smov [#allocation5]  }
   0x7   :  { %s30_s20 = sshll.u32 %s1027_s19, 4  ;;  %s31_s20 = int_to_ptr.vmem [resolvable:$true] %s30_s20 }
   0x8   :  { %33 = dma.hbm_to_vmem [thread:$0]  %s29_s16, 256, %s31_s20, [#allocation6]  }
   0x9   :  { %1018 = dma.done.wait [#allocation3], 49152  }
   0xa   :  { %1019 = vsyncadd [#allocation3], 4294918144 }
   0xb   :  { %1020 = dma.done.wait [#allocation6], 256  }
   0xc   :  { %1021 = vsyncadd [#allocation6], 4294967040  ;;  %v83_v0 = vld [vmem:[#allocation2 + $0xf8] sm:$0xff]  ;;  %v81_v2 = vld [vmem:[#allocation2 + $0xe8] sm:$0xff]  ;;  %s1028_s0 = smov [#allocation7]   ;;  %s930_s23 = sshll.u32 %s1055_s2, 4  ;;  %s931_s23 = int_to_ptr.hbm [resolvable:$true] %s930_s23 }
   0xd   :  { %v115_v1 = vld [vmem:[#allocation2 + $0x1f8] sm:$0xff]  ;;  %156 = vmatpush.msra.mxu2 %v83_v0  ;;  %v113_v3 = vld [vmem:[#allocation2 + $0x1e8] sm:$0xff]  ;;  %v82_v6 = vld [vmem:[#allocation2 + $0xf0] sm:$0xff]  ;;  %s928_s1 = sshll.u32 %s1028_s0, 4  ;;  %s929_s1 = int_to_ptr.vmem [resolvable:$true] %s928_s1 }
   0xe   :  { %176 = vmatpush.msra.mxu3 %v115_v1  ;;  %v79_v4 = vld [vmem:[#allocation2 + $0xd8] sm:$0xff]  ;;  %v114_v7 = vld [vmem:[#allocation2 + $0x1f0] sm:$0xff]  ;;  %v80_v8 = vld [vmem:[#allocation2 + $0xe0] sm:$0xff]  ;;  %116 = vmatpush.msra.mxu0 %v82_v6 }
   0xf   :  { %v111_v5 = vld [vmem:[#allocation2 + $0x1d8] sm:$0xff]  ;;  %157 = vmatpush.msra.mxu2 %v81_v2  ;;  %v112_v9 = vld [vmem:[#allocation2 + $0x1e0] sm:$0xff]  ;;  %136 = vmatpush.msra.mxu1 %v114_v7  ;;  %v77_v10 = vld [vmem:[#allocation2 + $0xc8] sm:$0xff] }
  0x10   :  { %177 = vmatpush.msra.mxu3 %v113_v3  ;;  %v109_v11 = vld [vmem:[#allocation2 + $0x1c8] sm:$0xff]  ;;  %v78_v12 = vld [vmem:[#allocation2 + $0xd0] sm:$0xff]  ;;  %117 = vmatpush.msra.mxu0 %v80_v8  ;;  %v75_v14 = vld [vmem:[#allocation2 + $0xb8] sm:$0xff] }
  0x11   :  { %158 = vmatpush.msra.mxu2 %v79_v4  ;;  %v110_v13 = vld [vmem:[#allocation2 + $0x1d0] sm:$0xff]  ;;  %137 = vmatpush.msra.mxu1 %v112_v9  ;;  %v107_v15 = vld [vmem:[#allocation2 + $0x1b8] sm:$0xff]  ;;  %v76_v16 = vld [vmem:[#allocation2 + $0xc0] sm:$0xff] }
  0x12   :  { %178 = vmatpush.msra.mxu3 %v111_v5  ;;  %v108_v17 = vld [vmem:[#allocation2 + $0x1c0] sm:$0xff]  ;;  %118 = vmatpush.msra.mxu0 %v78_v12  ;;  %v73_v18 = vld [vmem:[#allocation2 + $0xa8] sm:$0xff]  ;;  %v74_v20 = vld [vmem:[#allocation2 + $0xb0] sm:$0xff] }
  0x13   :  { %159 = vmatpush.msra.mxu2 %v77_v10  ;;  %138 = vmatpush.msra.mxu1 %v110_v13  ;;  %v105_v19 = vld [vmem:[#allocation2 + $0x1a8] sm:$0xff]  ;;  %v106_v21 = vld [vmem:[#allocation2 + $0x1b0] sm:$0xff]  ;;  %v71_v22 = vld [vmem:[#allocation2 + $0x98] sm:$0xff] }
  0x14   :  { %179 = vmatpush.msra.mxu3 %v109_v11  ;;  %119 = vmatpush.msra.mxu0 %v76_v16  ;;  %v103_v23 = vld [vmem:[#allocation2 + $0x198] sm:$0xff]  ;;  %v72_v24 = vld [vmem:[#allocation2 + $0xa0] sm:$0xff]  ;;  %v69_v26 = vld [vmem:[#allocation2 + $0x88] sm:$0xff] }
  0x15   :  { %160 = vmatpush.msra.mxu2 %v75_v14  ;;  %139 = vmatpush.msra.mxu1 %v108_v17  ;;  %v104_v25 = vld [vmem:[#allocation2 + $0x1a0] sm:$0xff]  ;;  %v101_v27 = vld [vmem:[#allocation2 + $0x188] sm:$0xff]  ;;  %v70_v28 = vld [vmem:[#allocation2 + $0x90] sm:$0xff] }
  0x16   :  { %180 = vmatpush.msra.mxu3 %v107_v15  ;;  %120 = vmatpush.msra.mxu0 %v74_v20  ;;  %v102_v29 = vld [vmem:[#allocation2 + $0x190] sm:$0xff]  ;;  %v67_v30 = vld [vmem:[#allocation2 + $0x78] sm:$0xff]  ;;  %v68_v32 = vld [vmem:[#allocation2 + $0x80] sm:$0xff] }
  0x17   :  { %161 = vmatpush.msra.mxu2 %v73_v18  ;;  %140 = vmatpush.msra.mxu1 %v106_v21  ;;  %v99_v31 = vld [vmem:[#allocation2 + $0x178] sm:$0xff]  ;;  %v100_v33 = vld [vmem:[#allocation2 + $0x180] sm:$0xff]  ;;  %v65_v34 = vld [vmem:[#allocation2 + $0x68] sm:$0xff] }
  0x18   :  { %181 = vmatpush.msra.mxu3 %v105_v19  ;;  %121 = vmatpush.msra.mxu0 %v72_v24  ;;  %v97_v35 = vld [vmem:[#allocation2 + $0x168] sm:$0xff]  ;;  %v66_v36 = vld [vmem:[#allocation2 + $0x70] sm:$0xff]  ;;  %v63_v38 = vld [vmem:[#allocation2 + $0x58] sm:$0xff] }
  0x19   :  { %162 = vmatpush.msra.mxu2 %v71_v22  ;;  %141 = vmatpush.msra.mxu1 %v104_v25  ;;  %v98_v37 = vld [vmem:[#allocation2 + $0x170] sm:$0xff]  ;;  %v95_v39 = vld [vmem:[#allocation2 + $0x158] sm:$0xff]  ;;  %v64_v40 = vld [vmem:[#allocation2 + $0x60] sm:$0xff] }
  0x1a   :  { %182 = vmatpush.msra.mxu3 %v103_v23  ;;  %122 = vmatpush.msra.mxu0 %v70_v28  ;;  %v96_v41 = vld [vmem:[#allocation2 + $0x160] sm:$0xff]  ;;  %v61_v42 = vld [vmem:[#allocation2 + $0x48] sm:$0xff]  ;;  %v62_v44 = vld [vmem:[#allocation2 + $0x50] sm:$0xff] }
  0x1b   :  { %163 = vmatpush.msra.mxu2 %v69_v26  ;;  %142 = vmatpush.msra.mxu1 %v102_v29  ;;  %v93_v43 = vld [vmem:[#allocation2 + $0x148] sm:$0xff]  ;;  %v94_v45 = vld [vmem:[#allocation2 + $0x150] sm:$0xff]  ;;  %v59_v46 = vld [vmem:[#allocation2 + $0x38] sm:$0xff] }
  0x1c   :  { %183 = vmatpush.msra.mxu3 %v101_v27  ;;  %123 = vmatpush.msra.mxu0 %v68_v32  ;;  %v91_v47 = vld [vmem:[#allocation2 + $0x138] sm:$0xff]  ;;  %v60_v48 = vld [vmem:[#allocation2 + $0x40] sm:$0xff]  ;;  %v57_v50 = vld [vmem:[#allocation2 + $0x28] sm:$0xff] }
  0x1d   :  { %164 = vmatpush.msra.mxu2 %v67_v30  ;;  %143 = vmatpush.msra.mxu1 %v100_v33  ;;  %v92_v49 = vld [vmem:[#allocation2 + $0x140] sm:$0xff]  ;;  %v89_v51 = vld [vmem:[#allocation2 + $0x128] sm:$0xff]  ;;  %v58_v52 = vld [vmem:[#allocation2 + $0x30] sm:$0xff] }
  0x1e   :  { %184 = vmatpush.msra.mxu3 %v99_v31  ;;  %124 = vmatpush.msra.mxu0 %v66_v36  ;;  %v90_v53 = vld [vmem:[#allocation2 + $0x130] sm:$0xff]  ;;  %v55_v54 = vld [vmem:[#allocation2 + $0x18] sm:$0xff]  ;;  %v56_v56 = vld [vmem:[#allocation2 + $0x20] sm:$0xff] }
  0x1f   :  { %165 = vmatpush.msra.mxu2 %v65_v34  ;;  %144 = vmatpush.msra.mxu1 %v98_v37  ;;  %v87_v55 = vld [vmem:[#allocation2 + $0x118] sm:$0xff]  ;;  %v88_v57 = vld [vmem:[#allocation2 + $0x120] sm:$0xff]  ;;  %v53_v58 = vld [vmem:[#allocation2 + $0x8] sm:$0xff] }
  0x20   :  { %185 = vmatpush.msra.mxu3 %v97_v35  ;;  %125 = vmatpush.msra.mxu0 %v64_v40  ;;  %v85_v59 = vld [vmem:[#allocation2 + $0x108] sm:$0xff]  ;;  %v46_v60 = vld [vmem:[#allocation5] sm:$0xff]  ;;  %v54_v62 = vld [vmem:[#allocation2 + $0x10] sm:$0xff] }
  0x21   :  { %166 = vmatpush.msra.mxu2 %v63_v38  ;;  %145 = vmatpush.msra.mxu1 %v96_v41  ;;  %v47_v61 = vld [vmem:[#allocation5 + $0x8] sm:$0xff]  ;;  %v86_v63 = vld [vmem:[#allocation2 + $0x110] sm:$0xff]  ;;  %v228_v0 = vld [vmem:[#allocation2 + $0x2f8] sm:$0xff] }
  0x22   :  { %186 = vmatpush.msra.mxu3 %v95_v39  ;;  %126 = vmatpush.msra.mxu0 %v62_v44  ;;  %v260_v1 = vld [vmem:[#allocation2 + $0x3f8] sm:$0xff]  ;;  %v52_v2 = vld [vmem:[#allocation2] sm:$0xff]  ;;  %v227_v4 = vld [vmem:[#allocation2 + $0x2f0] sm:$0xff] }
  0x23   :  { %167 = vmatpush.msra.mxu2 %v61_v42  ;;  %146 = vmatpush.msra.mxu1 %v94_v45  ;;  %v84_v3 = vld [vmem:[#allocation2 + $0x100] sm:$0xff]  ;;  %v259_v5 = vld [vmem:[#allocation2 + $0x3f0] sm:$0xff]  ;;  %v226_v6 = vld [vmem:[#allocation2 + $0x2e8] sm:$0xff] }
  0x24   :  { %187 = vmatpush.msra.mxu3 %v93_v43  ;;  %127 = vmatpush.msra.mxu0 %v60_v48  ;;  %v258_v7 = vld [vmem:[#allocation2 + $0x3e8] sm:$0xff]  ;;  %v225_v8 = vld [vmem:[#allocation2 + $0x2e0] sm:$0xff]  ;;  %v224_v10 = vld [vmem:[#allocation2 + $0x2d8] sm:$0xff] }
  0x25   :  { %168 = vmatpush.msra.mxu2 %v59_v46  ;;  %147 = vmatpush.msra.mxu1 %v92_v49  ;;  %v257_v9 = vld [vmem:[#allocation2 + $0x3e0] sm:$0xff]  ;;  %v256_v11 = vld [vmem:[#allocation2 + $0x3d8] sm:$0xff]  ;;  %v223_v12 = vld [vmem:[#allocation2 + $0x2d0] sm:$0xff] }
  0x26   :  { %188 = vmatpush.msra.mxu3 %v91_v47  ;;  %128 = vmatpush.msra.mxu0 %v58_v52  ;;  %v255_v13 = vld [vmem:[#allocation2 + $0x3d0] sm:$0xff]  ;;  %v222_v14 = vld [vmem:[#allocation2 + $0x2c8] sm:$0xff]  ;;  %v221_v16 = vld [vmem:[#allocation2 + $0x2c0] sm:$0xff] }
  0x27   :  { %169 = vmatpush.msra.mxu2 %v57_v50  ;;  %148 = vmatpush.msra.mxu1 %v90_v53  ;;  %v254_v15 = vld [vmem:[#allocation2 + $0x3c8] sm:$0xff]  ;;  %v253_v17 = vld [vmem:[#allocation2 + $0x3c0] sm:$0xff]  ;;  %v220_v18 = vld [vmem:[#allocation2 + $0x2b8] sm:$0xff] }
  0x28   :  { %189 = vmatpush.msra.mxu3 %v89_v51  ;;  %129 = vmatpush.msra.mxu0 %v56_v56  ;;  %v252_v19 = vld [vmem:[#allocation2 + $0x3b8] sm:$0xff]  ;;  %v219_v20 = vld [vmem:[#allocation2 + $0x2b0] sm:$0xff]  ;;  %v218_v22 = vld [vmem:[#allocation2 + $0x2a8] sm:$0xff] }
  0x29   :  { %170 = vmatpush.msra.mxu2 %v55_v54  ;;  %149 = vmatpush.msra.mxu1 %v88_v57  ;;  %v251_v21 = vld [vmem:[#allocation2 + $0x3b0] sm:$0xff]  ;;  %v250_v23 = vld [vmem:[#allocation2 + $0x3a8] sm:$0xff]  ;;  %v217_v24 = vld [vmem:[#allocation2 + $0x2a0] sm:$0xff] }
  0x2a   :  { %190 = vmatpush.msra.mxu3 %v87_v55  ;;  %130 = vmatpush.msra.mxu0 %v54_v62  ;;  %v249_v25 = vld [vmem:[#allocation2 + $0x3a0] sm:$0xff]  ;;  %v216_v26 = vld [vmem:[#allocation2 + $0x298] sm:$0xff]  ;;  %v215_v28 = vld [vmem:[#allocation2 + $0x290] sm:$0xff] }
  0x2b   :  { %171 = vmatpush.msra.mxu2 %v53_v58  ;;  %150 = vmatpush.msra.mxu1 %v86_v63  ;;  %v248_v27 = vld [vmem:[#allocation2 + $0x398] sm:$0xff]  ;;  %v247_v29 = vld [vmem:[#allocation2 + $0x390] sm:$0xff]  ;;  %v214_v30 = vld [vmem:[#allocation2 + $0x288] sm:$0xff] }
  0x2c   :  { %191 = vmatpush.msra.mxu3 %v85_v59  ;;  %172 = vmatmul.f32.vlgmr.msra.gmra.mxu2 %v46_v60  ;;  %v246_v31 = vld [vmem:[#allocation2 + $0x388] sm:$0xff]  ;;  %v213_v32 = vld [vmem:[#allocation2 + $0x280] sm:$0xff]  ;;  %v212_v34 = vld [vmem:[#allocation2 + $0x278] sm:$0xff] }
  0x2d   :  { %192 = vmatmul.f32.vlgmr.msra.gmra.mxu3 %v47_v61  ;;  %301 = vmatpush.msrb.mxu2 %v228_v0  ;;  %v245_v33 = vld [vmem:[#allocation2 + $0x380] sm:$0xff]  ;;  %v244_v35 = vld [vmem:[#allocation2 + $0x378] sm:$0xff]  ;;  %v211_v36 = vld [vmem:[#allocation2 + $0x270] sm:$0xff] }
  0x2e   :  { %321 = vmatpush.msrb.mxu3 %v260_v1  ;;  %131 = vmatpush.msra.mxu0 %v52_v2  ;;  %v243_v37 = vld [vmem:[#allocation2 + $0x370] sm:$0xff]  ;;  %v210_v38 = vld [vmem:[#allocation2 + $0x268] sm:$0xff]  ;;  %v209_v40 = vld [vmem:[#allocation2 + $0x260] sm:$0xff] }
  0x2f   :  { %151 = vmatpush.msra.mxu1 %v84_v3  ;;  %132 = vmatmul.f32.vlgmr.msra.gmra.mxu0 %v46_v60  ;;  %v242_v39 = vld [vmem:[#allocation2 + $0x368] sm:$0xff]  ;;  %v241_v41 = vld [vmem:[#allocation2 + $0x360] sm:$0xff]  ;;  %v208_v42 = vld [vmem:[#allocation2 + $0x258] sm:$0xff] }
  0x30   :  { %152 = vmatmul.f32.vlgmr.msra.gmra.mxu1 %v47_v61  ;;  %261 = vmatpush.msrb.mxu0 %v227_v4  ;;  %v240_v43 = vld [vmem:[#allocation2 + $0x358] sm:$0xff]  ;;  %v207_v44 = vld [vmem:[#allocation2 + $0x250] sm:$0xff]  ;;  %v206_v46 = vld [vmem:[#allocation2 + $0x248] sm:$0xff] }
  0x31   :  { %281 = vmatpush.msrb.mxu1 %v259_v5  ;;  %302 = vmatpush.msrb.mxu2 %v226_v6  ;;  %v239_v45 = vld [vmem:[#allocation2 + $0x350] sm:$0xff]  ;;  %v238_v47 = vld [vmem:[#allocation2 + $0x348] sm:$0xff]  ;;  %v205_v48 = vld [vmem:[#allocation2 + $0x240] sm:$0xff] }
  0x32   :  { %322 = vmatpush.msrb.mxu3 %v258_v7  ;;  %262 = vmatpush.msrb.mxu0 %v225_v8  ;;  %v237_v49 = vld [vmem:[#allocation2 + $0x340] sm:$0xff]  ;;  %v204_v50 = vld [vmem:[#allocation2 + $0x238] sm:$0xff]  ;;  %v203_v52 = vld [vmem:[#allocation2 + $0x230] sm:$0xff] }
  0x33   :  { %282 = vmatpush.msrb.mxu1 %v257_v9  ;;  %303 = vmatpush.msrb.mxu2 %v224_v10  ;;  %v236_v51 = vld [vmem:[#allocation2 + $0x338] sm:$0xff]  ;;  %v235_v53 = vld [vmem:[#allocation2 + $0x330] sm:$0xff]  ;;  %v202_v54 = vld [vmem:[#allocation2 + $0x228] sm:$0xff] }
  0x34   :  { %323 = vmatpush.msrb.mxu3 %v256_v11  ;;  %263 = vmatpush.msrb.mxu0 %v223_v12  ;;  %v234_v55 = vld [vmem:[#allocation2 + $0x328] sm:$0xff]  ;;  %v201_v56 = vld [vmem:[#allocation2 + $0x220] sm:$0xff]  ;;  %v199_v58 = vld [vmem:[#allocation2 + $0x210] sm:$0xff] }
  0x35   :  { %283 = vmatpush.msrb.mxu1 %v255_v13  ;;  %304 = vmatpush.msrb.mxu2 %v222_v14  ;;  %v233_v57 = vld [vmem:[#allocation2 + $0x320] sm:$0xff]  ;;  %v231_v59 = vld [vmem:[#allocation2 + $0x310] sm:$0xff]  ;;  %v200_v60 = vld [vmem:[#allocation2 + $0x218] sm:$0xff] }
  0x36   :  { %324 = vmatpush.msrb.mxu3 %v254_v15  ;;  %264 = vmatpush.msrb.mxu0 %v221_v16  ;;  %v232_v61 = vld [vmem:[#allocation2 + $0x318] sm:$0xff]  ;;  %v197_v62 = vld [vmem:[#allocation2 + $0x200] sm:$0xff]  ;;  %v198_v0 = vld [vmem:[#allocation2 + $0x208] sm:$0xff] }
  0x37   :  { %284 = vmatpush.msrb.mxu1 %v253_v17  ;;  %305 = vmatpush.msrb.mxu2 %v220_v18  ;;  %v229_v63 = vld [vmem:[#allocation2 + $0x300] sm:$0xff]  ;;  %v230_v1 = vld [vmem:[#allocation2 + $0x308] sm:$0xff]  ;;  %v372_v2 = vld [vmem:[#allocation2 + $0x4f0] sm:$0xff] }
  0x38   :  { %325 = vmatpush.msrb.mxu3 %v252_v19  ;;  %265 = vmatpush.msrb.mxu0 %v219_v20  ;;  %v373_v3 = vld [vmem:[#allocation2 + $0x4f8] sm:$0xff]  ;;  %v370_v4 = vld [vmem:[#allocation2 + $0x4e0] sm:$0xff]  ;;  %v371_v5 = vld [vmem:[#allocation2 + $0x4e8] sm:$0xff] }
  0x39   :  { %285 = vmatpush.msrb.mxu1 %v251_v21  ;;  %306 = vmatpush.msrb.mxu2 %v218_v22  ;;  %v368_v6 = vld [vmem:[#allocation2 + $0x4d0] sm:$0xff]  ;;  %v369_v7 = vld [vmem:[#allocation2 + $0x4d8] sm:$0xff]  ;;  %v402_v10 = vld [vmem:[#allocation2 + $0x5e0] sm:$0xff] }
  0x3a   :  { %326 = vmatpush.msrb.mxu3 %v250_v23  ;;  %266 = vmatpush.msrb.mxu0 %v217_v24  ;;  %v404_v8 = vld [vmem:[#allocation2 + $0x5f0] sm:$0xff]  ;;  %v405_v9 = vld [vmem:[#allocation2 + $0x5f8] sm:$0xff]  ;;  %v366_v11 = vld [vmem:[#allocation2 + $0x4c0] sm:$0xff] }
  0x3b   :  { %286 = vmatpush.msrb.mxu1 %v249_v25  ;;  %307 = vmatpush.msrb.mxu2 %v216_v26  ;;  %v367_v12 = vld [vmem:[#allocation2 + $0x4c8] sm:$0xff]  ;;  %v400_v14 = vld [vmem:[#allocation2 + $0x5d0] sm:$0xff]  ;;  %v401_v15 = vld [vmem:[#allocation2 + $0x5d8] sm:$0xff] }
  0x3c   :  { %327 = vmatpush.msrb.mxu3 %v248_v27  ;;  %267 = vmatpush.msrb.mxu0 %v215_v28  ;;  %v403_v13 = vld [vmem:[#allocation2 + $0x5e8] sm:$0xff]  ;;  %v364_v16 = vld [vmem:[#allocation2 + $0x4b0] sm:$0xff]  ;;  %v365_v17 = vld [vmem:[#allocation2 + $0x4b8] sm:$0xff] }
  0x3d   :  { %287 = vmatpush.msrb.mxu1 %v247_v29  ;;  %308 = vmatpush.msrb.mxu2 %v214_v30  ;;  %v398_v18 = vld [vmem:[#allocation2 + $0x5c0] sm:$0xff]  ;;  %v399_v19 = vld [vmem:[#allocation2 + $0x5c8] sm:$0xff]  ;;  %v396_v22 = vld [vmem:[#allocation2 + $0x5b0] sm:$0xff] }
  0x3e   :  { %328 = vmatpush.msrb.mxu3 %v246_v31  ;;  %268 = vmatpush.msrb.mxu0 %v213_v32  ;;  %v362_v20 = vld [vmem:[#allocation2 + $0x4a0] sm:$0xff]  ;;  %v363_v21 = vld [vmem:[#allocation2 + $0x4a8] sm:$0xff]  ;;  %v397_v23 = vld [vmem:[#allocation2 + $0x5b8] sm:$0xff] }
  0x3f   :  { %288 = vmatpush.msrb.mxu1 %v245_v33  ;;  %309 = vmatpush.msrb.mxu2 %v212_v34  ;;  %v360_v24 = vld [vmem:[#allocation2 + $0x490] sm:$0xff]  ;;  %v361_v25 = vld [vmem:[#allocation2 + $0x498] sm:$0xff]  ;;  %v394_v26 = vld [vmem:[#allocation2 + $0x5a0] sm:$0xff] }
  0x40   :  { %329 = vmatpush.msrb.mxu3 %v244_v35  ;;  %269 = vmatpush.msrb.mxu0 %v211_v36  ;;  %v395_v27 = vld [vmem:[#allocation2 + $0x5a8] sm:$0xff]  ;;  %v358_v28 = vld [vmem:[#allocation2 + $0x480] sm:$0xff]  ;;  %v392_v30 = vld [vmem:[#allocation2 + $0x590] sm:$0xff] }
  0x41   :  { %289 = vmatpush.msrb.mxu1 %v243_v37  ;;  %310 = vmatpush.msrb.mxu2 %v210_v38  ;;  %v359_v29 = vld [vmem:[#allocation2 + $0x488] sm:$0xff]  ;;  %v393_v31 = vld [vmem:[#allocation2 + $0x598] sm:$0xff]  ;;  %v356_v32 = vld [vmem:[#allocation2 + $0x470] sm:$0xff] }
  0x42   :  { %330 = vmatpush.msrb.mxu3 %v242_v39  ;;  %270 = vmatpush.msrb.mxu0 %v209_v40  ;;  %v357_v33 = vld [vmem:[#allocation2 + $0x478] sm:$0xff]  ;;  %v390_v34 = vld [vmem:[#allocation2 + $0x580] sm:$0xff]  ;;  %v391_v35 = vld [vmem:[#allocation2 + $0x588] sm:$0xff] }
  0x43   :  { %290 = vmatpush.msrb.mxu1 %v241_v41  ;;  %311 = vmatpush.msrb.mxu2 %v208_v42  ;;  %v354_v36 = vld [vmem:[#allocation2 + $0x460] sm:$0xff]  ;;  %v355_v37 = vld [vmem:[#allocation2 + $0x468] sm:$0xff]  ;;  %v388_v38 = vld [vmem:[#allocation2 + $0x570] sm:$0xff] }
  0x44   :  { %331 = vmatpush.msrb.mxu3 %v240_v43  ;;  %271 = vmatpush.msrb.mxu0 %v207_v44  ;;  %v389_v39 = vld [vmem:[#allocation2 + $0x578] sm:$0xff]  ;;  %v352_v40 = vld [vmem:[#allocation2 + $0x450] sm:$0xff]  ;;  %v386_v42 = vld [vmem:[#allocation2 + $0x560] sm:$0xff] }
  0x45   :  { %291 = vmatpush.msrb.mxu1 %v239_v45  ;;  %312 = vmatpush.msrb.mxu2 %v206_v46  ;;  %v353_v41 = vld [vmem:[#allocation2 + $0x458] sm:$0xff]  ;;  %v387_v43 = vld [vmem:[#allocation2 + $0x568] sm:$0xff]  ;;  %v350_v44 = vld [vmem:[#allocation2 + $0x440] sm:$0xff] }
  0x46   :  { %332 = vmatpush.msrb.mxu3 %v238_v47  ;;  %272 = vmatpush.msrb.mxu0 %v205_v48  ;;  %v351_v45 = vld [vmem:[#allocation2 + $0x448] sm:$0xff]  ;;  %v384_v46 = vld [vmem:[#allocation2 + $0x550] sm:$0xff]  ;;  %v385_v47 = vld [vmem:[#allocation2 + $0x558] sm:$0xff] }
  0x47   :  { %292 = vmatpush.msrb.mxu1 %v237_v49  ;;  %313 = vmatpush.msrb.mxu2 %v204_v50  ;;  %v348_v48 = vld [vmem:[#allocation2 + $0x430] sm:$0xff]  ;;  %v349_v49 = vld [vmem:[#allocation2 + $0x438] sm:$0xff]  ;;  %v346_v50 = vld [vmem:[#allocation2 + $0x420] sm:$0xff] }
  0x48   :  { %333 = vmatpush.msrb.mxu3 %v236_v51  ;;  %273 = vmatpush.msrb.mxu0 %v203_v52  ;;  %v347_v51 = vld [vmem:[#allocation2 + $0x428] sm:$0xff] }
  0x49   :  { %293 = vmatpush.msrb.mxu1 %v235_v53  ;;  %314 = vmatpush.msrb.mxu2 %v202_v54 }
  0x4a   :  { %334 = vmatpush.msrb.mxu3 %v234_v55  ;;  %274 = vmatpush.msrb.mxu0 %v201_v56 }
  0x4b   :  { %294 = vmatpush.msrb.mxu1 %v233_v57  ;;  %315 = vmatpush.msrb.mxu2 %v200_v60  ;;  %v345_v60 = vld [vmem:[#allocation2 + $0x418] sm:$0xff] }
  0x4c   :  { %275 = vmatpush.msrb.mxu0 %v199_v58  ;;  %335 = vmatpush.msrb.mxu3 %v232_v61  ;;  %v344_v58 = vld [vmem:[#allocation2 + $0x410] sm:$0xff]  ;;  %v383_v61 = vld [vmem:[#allocation2 + $0x548] sm:$0xff] }
  0x4d   :  { %295 = vmatpush.msrb.mxu1 %v231_v59  ;;  %316 = vmatpush.msrb.mxu2 %v198_v0  ;;  %v382_v59 = vld [vmem:[#allocation2 + $0x540] sm:$0xff]  ;;  %v343_v0 = vld [vmem:[#allocation2 + $0x408] sm:$0xff] }
  0x4e   :  { %276 = vmatpush.msrb.mxu0 %v197_v62  ;;  %336 = vmatpush.msrb.mxu3 %v230_v1  ;;  %v342_v62 = vld [vmem:[#allocation2 + $0x400] sm:$0xff]  ;;  %v381_v1 = vld [vmem:[#allocation2 + $0x538] sm:$0xff] }
  0x4f   :  { %296 = vmatpush.msrb.mxu1 %v229_v63  ;;  %446 = vmatpush.msra.mxu2 %v373_v3  ;;  %v380_v63 = vld [vmem:[#allocation2 + $0x530] sm:$0xff]  ;;  %v379_v3 = vld [vmem:[#allocation2 + $0x528] sm:$0xff] }
  0x50   :  { %406 = vmatpush.msra.mxu0 %v372_v2  ;;  %466 = vmatpush.msra.mxu3 %v405_v9  ;;  %v378_v2 = vld [vmem:[#allocation2 + $0x520] sm:$0xff]  ;;  %v518_v9 = vld [vmem:[#allocation2 + $0x6f8] sm:$0xff] }
  0x51   :  { %447 = vmatpush.msra.mxu2 %v371_v5  ;;  %426 = vmatpush.msra.mxu1 %v404_v8  ;;  %v377_v5 = vld [vmem:[#allocation2 + $0x518] sm:$0xff]  ;;  %v517_v8 = vld [vmem:[#allocation2 + $0x6f0] sm:$0xff] }
  0x52   :  { %407 = vmatpush.msra.mxu0 %v370_v4  ;;  %467 = vmatpush.msra.mxu3 %v403_v13  ;;  %v376_v4 = vld [vmem:[#allocation2 + $0x510] sm:$0xff]  ;;  %v514_v13 = vld [vmem:[#allocation2 + $0x6d8] sm:$0xff] }
  0x53   :  { %448 = vmatpush.msra.mxu2 %v369_v7  ;;  %427 = vmatpush.msra.mxu1 %v402_v10  ;;  %v375_v7 = vld [vmem:[#allocation2 + $0x508] sm:$0xff]  ;;  %v515_v10 = vld [vmem:[#allocation2 + $0x6e0] sm:$0xff] }
  0x54   :  { %408 = vmatpush.msra.mxu0 %v368_v6  ;;  %468 = vmatpush.msra.mxu3 %v401_v15  ;;  %v374_v6 = vld [vmem:[#allocation2 + $0x500] sm:$0xff]  ;;  %v550_v15 = vld [vmem:[#allocation2 + $0x7f8] sm:$0xff] }
  0x55   :  { %449 = vmatpush.msra.mxu2 %v367_v12  ;;  %428 = vmatpush.msra.mxu1 %v400_v14  ;;  %v513_v12 = vld [vmem:[#allocation2 + $0x6d0] sm:$0xff] }
  0x56   :  { %409 = vmatpush.msra.mxu0 %v366_v11  ;;  %469 = vmatpush.msra.mxu3 %v399_v19  ;;  %v516_v11 = vld [vmem:[#allocation2 + $0x6e8] sm:$0xff]  ;;  %v549_v14 = vld [vmem:[#allocation2 + $0x7f0] sm:$0xff] }
  0x57   :  { %450 = vmatpush.msra.mxu2 %v365_v17  ;;  %429 = vmatpush.msra.mxu1 %v398_v18  ;;  %v511_v17 = vld [vmem:[#allocation2 + $0x6c0] sm:$0xff]  ;;  %v512_v18 = vld [vmem:[#allocation2 + $0x6c8] sm:$0xff] }
  0x58   :  { %410 = vmatpush.msra.mxu0 %v364_v16  ;;  %470 = vmatpush.msra.mxu3 %v397_v23  ;;  %v547_v16 = vld [vmem:[#allocation2 + $0x7e0] sm:$0xff]  ;;  %v548_v19 = vld [vmem:[#allocation2 + $0x7e8] sm:$0xff]  ;;  %v510_v23 = vld [vmem:[#allocation2 + $0x6b8] sm:$0xff] }
  0x59   :  { %451 = vmatpush.msra.mxu2 %v363_v21  ;;  %430 = vmatpush.msra.mxu1 %v396_v22  ;;  %v546_v21 = vld [vmem:[#allocation2 + $0x7d8] sm:$0xff]  ;;  %v509_v22 = vld [vmem:[#allocation2 + $0x6b0] sm:$0xff] }
  0x5a   :  { %411 = vmatpush.msra.mxu0 %v362_v20  ;;  %471 = vmatpush.msra.mxu3 %v395_v27  ;;  %v545_v20 = vld [vmem:[#allocation2 + $0x7d0] sm:$0xff]  ;;  %v508_v27 = vld [vmem:[#allocation2 + $0x6a8] sm:$0xff] }
  0x5b   :  { %452 = vmatpush.msra.mxu2 %v361_v25  ;;  %431 = vmatpush.msra.mxu1 %v394_v26  ;;  %v544_v25 = vld [vmem:[#allocation2 + $0x7c8] sm:$0xff]  ;;  %v507_v26 = vld [vmem:[#allocation2 + $0x6a0] sm:$0xff] }
  0x5c   :  { %412 = vmatpush.msra.mxu0 %v360_v24  ;;  %472 = vmatpush.msra.mxu3 %v393_v31  ;;  %v543_v24 = vld [vmem:[#allocation2 + $0x7c0] sm:$0xff]  ;;  %v506_v31 = vld [vmem:[#allocation2 + $0x698] sm:$0xff] }
  0x5d   :  { %453 = vmatpush.msra.mxu2 %v359_v29  ;;  %432 = vmatpush.msra.mxu1 %v392_v30  ;;  %v542_v29 = vld [vmem:[#allocation2 + $0x7b8] sm:$0xff]  ;;  %v505_v30 = vld [vmem:[#allocation2 + $0x690] sm:$0xff] }
  0x5e   :  { %413 = vmatpush.msra.mxu0 %v358_v28  ;;  %473 = vmatpush.msra.mxu3 %v391_v35  ;;  %v541_v28 = vld [vmem:[#allocation2 + $0x7b0] sm:$0xff]  ;;  %v504_v35 = vld [vmem:[#allocation2 + $0x688] sm:$0xff] }
  0x5f   :  { %454 = vmatpush.msra.mxu2 %v357_v33  ;;  %433 = vmatpush.msra.mxu1 %v390_v34  ;;  %v540_v33 = vld [vmem:[#allocation2 + $0x7a8] sm:$0xff]  ;;  %v503_v34 = vld [vmem:[#allocation2 + $0x680] sm:$0xff] }
  0x60   :  { %414 = vmatpush.msra.mxu0 %v356_v32  ;;  %474 = vmatpush.msra.mxu3 %v389_v39  ;;  %v539_v32 = vld [vmem:[#allocation2 + $0x7a0] sm:$0xff]  ;;  %v502_v39 = vld [vmem:[#allocation2 + $0x678] sm:$0xff] }
  0x61   :  { %455 = vmatpush.msra.mxu2 %v355_v37  ;;  %434 = vmatpush.msra.mxu1 %v388_v38  ;;  %v538_v37 = vld [vmem:[#allocation2 + $0x798] sm:$0xff]  ;;  %v501_v38 = vld [vmem:[#allocation2 + $0x670] sm:$0xff] }
  0x62   :  { %415 = vmatpush.msra.mxu0 %v354_v36  ;;  %475 = vmatpush.msra.mxu3 %v387_v43  ;;  %v537_v36 = vld [vmem:[#allocation2 + $0x790] sm:$0xff]  ;;  %v500_v43 = vld [vmem:[#allocation2 + $0x668] sm:$0xff] }
  0x63   :  { %456 = vmatpush.msra.mxu2 %v353_v41  ;;  %435 = vmatpush.msra.mxu1 %v386_v42  ;;  %v536_v41 = vld [vmem:[#allocation2 + $0x788] sm:$0xff]  ;;  %v499_v42 = vld [vmem:[#allocation2 + $0x660] sm:$0xff] }
  0x64   :  { %416 = vmatpush.msra.mxu0 %v352_v40  ;;  %476 = vmatpush.msra.mxu3 %v385_v47  ;;  %v535_v40 = vld [vmem:[#allocation2 + $0x780] sm:$0xff] }
  0x65   :  { %457 = vmatpush.msra.mxu2 %v351_v45  ;;  %436 = vmatpush.msra.mxu1 %v384_v46  ;;  %v498_v45 = vld [vmem:[#allocation2 + $0x658] sm:$0xff] }
  0x66   :  { %417 = vmatpush.msra.mxu0 %v350_v44  ;;  %477 = vmatpush.msra.mxu3 %v383_v61  ;;  %v497_v44 = vld [vmem:[#allocation2 + $0x650] sm:$0xff] }
  0x67   :  { %458 = vmatpush.msra.mxu2 %v349_v49  ;;  %437 = vmatpush.msra.mxu1 %v382_v59  ;;  %v532_v59 = vld [vmem:[#allocation2 + $0x768] sm:$0xff]  ;;  %v529_v61 = vld [vmem:[#allocation2 + $0x750] sm:$0xff] }
  0x68   :  { %418 = vmatpush.msra.mxu0 %v348_v48  ;;  %478 = vmatpush.msra.mxu3 %v381_v1  ;;  %v527_v1 = vld [vmem:[#allocation2 + $0x740] sm:$0xff] }
  0x69   :  { %459 = vmatpush.msra.mxu2 %v347_v51  ;;  %438 = vmatpush.msra.mxu1 %v380_v63  ;;  %v530_v63 = vld [vmem:[#allocation2 + $0x758] sm:$0xff] }
  0x6a   :  { %419 = vmatpush.msra.mxu0 %v346_v50  ;;  %479 = vmatpush.msra.mxu3 %v379_v3  ;;  %v528_v3 = vld [vmem:[#allocation2 + $0x748] sm:$0xff] }
  0x6b   :  { %460 = vmatpush.msra.mxu2 %v345_v60  ;;  %439 = vmatpush.msra.mxu1 %v378_v2  ;;  %v491_v60 = vld [vmem:[#allocation2 + $0x620] sm:$0xff]  ;;  %v490_v2 = vld [vmem:[#allocation2 + $0x618] sm:$0xff] }
  0x6c   :  { %420 = vmatpush.msra.mxu0 %v344_v58  ;;  %480 = vmatpush.msra.mxu3 %v377_v5  ;;  %v494_v58 = vld [vmem:[#allocation2 + $0x638] sm:$0xff]  ;;  %v525_v5 = vld [vmem:[#allocation2 + $0x730] sm:$0xff] }
  0x6d   :  { %461 = vmatpush.msra.mxu2 %v343_v0  ;;  %440 = vmatpush.msra.mxu1 %v376_v4  ;;  %v489_v0 = vld [vmem:[#allocation2 + $0x610] sm:$0xff]  ;;  %v487_v4 = vld [vmem:[#allocation2 + $0x600] sm:$0xff] }
  0x6e   :  { %421 = vmatpush.msra.mxu0 %v342_v62  ;;  %481 = vmatpush.msra.mxu3 %v375_v7  ;;  %v492_v62 = vld [vmem:[#allocation2 + $0x628] sm:$0xff]  ;;  %v526_v7 = vld [vmem:[#allocation2 + $0x738] sm:$0xff] }
  0x6f   :  { %441 = vmatpush.msra.mxu1 %v374_v6  ;;  %v488_v6 = vld [vmem:[#allocation2 + $0x608] sm:$0xff] }
  0xac   :  { %v133_v52 = vpop.f32.mrf.mxu0 }
  0xad   :  { %v153_v53 = vpop.f32.mrf.mxu1 }
  0xae   :  { %v154_v54 = vadd.f32 %v153_v53, %v133_v52  ;;  %v495_v52 = vld [vmem:[#allocation2 + $0x640] sm:$0xff]  ;;  %v533_v53 = vld [vmem:[#allocation2 + $0x770] sm:$0xff] }
  0xaf   :  { %v173_v55 = vpop.f32.mrf.mxu2 }
  0xb0   :  { %v193_v56 = vpop.f32.mrf.mxu3  ;;  %277 = vmatmul.f32.vlgmr.msrb.gmra.mxu0 %v154_v54  ;;  %317 = vmatmul.f32.vlgmr.msrb.gmra.mxu2 %v154_v54  ;;  %v496_v54 = vld [vmem:[#allocation2 + $0x648] sm:$0xff] }
  0xb1   :  { %v194_v57 = vadd.f32 %v193_v56, %v173_v55  ;;  %551 = vmatpush.msrb.mxu0 %v517_v8  ;;  %591 = vmatpush.msrb.mxu2 %v518_v9  ;;  %v534_v55 = vld [vmem:[#allocation2 + $0x778] sm:$0xff]  ;;  %v493_v56 = vld [vmem:[#allocation2 + $0x630] sm:$0xff]  ;;  %v523_v8 = vld [vmem:[#allocation2 + $0x720] sm:$0xff] }
  0xb2   :  { %v524_v9 = vld [vmem:[#allocation2 + $0x728] sm:$0xff] }
  0xb3   :  { %297 = vmatmul.f32.vlgmr.msrb.gmra.mxu1 %v194_v57  ;;  %337 = vmatmul.f32.vlgmr.msrb.gmra.mxu3 %v194_v57  ;;  %v531_v57 = vld [vmem:[#allocation2 + $0x760] sm:$0xff] }
  0xb4   :  { %552 = vmatpush.msrb.mxu0 %v515_v10  ;;  %592 = vmatpush.msrb.mxu2 %v516_v11  ;;  %v521_v10 = vld [vmem:[#allocation2 + $0x710] sm:$0xff]  ;;  %v522_v11 = vld [vmem:[#allocation2 + $0x718] sm:$0xff] }
  0xb5   :  { %571 = vmatpush.msrb.mxu1 %v549_v14  ;;  %611 = vmatpush.msrb.mxu3 %v550_v15  ;;  %v662_v14 = vld [vmem:[#allocation2 + $0x8f0] sm:$0xff]  ;;  %v663_v15 = vld [vmem:[#allocation2 + $0x8f8] sm:$0xff] }
  0xb6   :  { %553 = vmatpush.msrb.mxu0 %v513_v12  ;;  %593 = vmatpush.msrb.mxu2 %v514_v13  ;;  %v519_v12 = vld [vmem:[#allocation2 + $0x700] sm:$0xff]  ;;  %v520_v13 = vld [vmem:[#allocation2 + $0x708] sm:$0xff] }
  0xb7   :  { %572 = vmatpush.msrb.mxu1 %v547_v16  ;;  %612 = vmatpush.msrb.mxu3 %v548_v19  ;;  %v660_v16 = vld [vmem:[#allocation2 + $0x8e0] sm:$0xff]  ;;  %v659_v19 = vld [vmem:[#allocation2 + $0x8d8] sm:$0xff] }
  0xb8   :  { %554 = vmatpush.msrb.mxu0 %v511_v17  ;;  %594 = vmatpush.msrb.mxu2 %v512_v18  ;;  %v661_v17 = vld [vmem:[#allocation2 + $0x8e8] sm:$0xff]  ;;  %v658_v18 = vld [vmem:[#allocation2 + $0x8d0] sm:$0xff] }
  0xb9   :  { %573 = vmatpush.msrb.mxu1 %v545_v20  ;;  %613 = vmatpush.msrb.mxu3 %v546_v21  ;;  %v694_v20 = vld [vmem:[#allocation2 + $0x9f0] sm:$0xff]  ;;  %v695_v21 = vld [vmem:[#allocation2 + $0x9f8] sm:$0xff] }
  0xba   :  { %555 = vmatpush.msrb.mxu0 %v509_v22  ;;  %595 = vmatpush.msrb.mxu2 %v510_v23  ;;  %v692_v22 = vld [vmem:[#allocation2 + $0x9e0] sm:$0xff] }
  0xbb   :  { %574 = vmatpush.msrb.mxu1 %v543_v24  ;;  %614 = vmatpush.msrb.mxu3 %v544_v25  ;;  %v656_v23 = vld [vmem:[#allocation2 + $0x8c0] sm:$0xff]  ;;  %v657_v24 = vld [vmem:[#allocation2 + $0x8c8] sm:$0xff] }
  0xbc   :  { %556 = vmatpush.msrb.mxu0 %v507_v26  ;;  %596 = vmatpush.msrb.mxu2 %v508_v27  ;;  %v693_v25 = vld [vmem:[#allocation2 + $0x9e8] sm:$0xff]  ;;  %v690_v26 = vld [vmem:[#allocation2 + $0x9d0] sm:$0xff]  ;;  %v691_v27 = vld [vmem:[#allocation2 + $0x9d8] sm:$0xff] }
  0xbd   :  { %575 = vmatpush.msrb.mxu1 %v541_v28  ;;  %615 = vmatpush.msrb.mxu3 %v542_v29  ;;  %v654_v28 = vld [vmem:[#allocation2 + $0x8b0] sm:$0xff]  ;;  %v655_v29 = vld [vmem:[#allocation2 + $0x8b8] sm:$0xff] }
  0xbe   :  { %557 = vmatpush.msrb.mxu0 %v505_v30  ;;  %597 = vmatpush.msrb.mxu2 %v506_v31  ;;  %v688_v30 = vld [vmem:[#allocation2 + $0x9c0] sm:$0xff]  ;;  %v689_v31 = vld [vmem:[#allocation2 + $0x9c8] sm:$0xff] }
  0xbf   :  { %576 = vmatpush.msrb.mxu1 %v539_v32  ;;  %616 = vmatpush.msrb.mxu3 %v540_v33  ;;  %v652_v32 = vld [vmem:[#allocation2 + $0x8a0] sm:$0xff]  ;;  %v653_v33 = vld [vmem:[#allocation2 + $0x8a8] sm:$0xff] }
  0xc0   :  { %558 = vmatpush.msrb.mxu0 %v503_v34  ;;  %598 = vmatpush.msrb.mxu2 %v504_v35  ;;  %v686_v34 = vld [vmem:[#allocation2 + $0x9b0] sm:$0xff]  ;;  %v687_v35 = vld [vmem:[#allocation2 + $0x9b8] sm:$0xff] }
  0xc1   :  { %577 = vmatpush.msrb.mxu1 %v537_v36  ;;  %617 = vmatpush.msrb.mxu3 %v538_v37  ;;  %v650_v36 = vld [vmem:[#allocation2 + $0x890] sm:$0xff]  ;;  %v651_v37 = vld [vmem:[#allocation2 + $0x898] sm:$0xff] }
  0xc2   :  { %559 = vmatpush.msrb.mxu0 %v501_v38  ;;  %599 = vmatpush.msrb.mxu2 %v502_v39  ;;  %v684_v38 = vld [vmem:[#allocation2 + $0x9a0] sm:$0xff]  ;;  %v685_v39 = vld [vmem:[#allocation2 + $0x9a8] sm:$0xff] }
  0xc3   :  { %578 = vmatpush.msrb.mxu1 %v535_v40  ;;  %618 = vmatpush.msrb.mxu3 %v536_v41  ;;  %v648_v40 = vld [vmem:[#allocation2 + $0x880] sm:$0xff]  ;;  %v649_v41 = vld [vmem:[#allocation2 + $0x888] sm:$0xff] }
  0xc4   :  { %560 = vmatpush.msrb.mxu0 %v499_v42  ;;  %600 = vmatpush.msrb.mxu2 %v500_v43  ;;  %v682_v42 = vld [vmem:[#allocation2 + $0x990] sm:$0xff]  ;;  %v683_v43 = vld [vmem:[#allocation2 + $0x998] sm:$0xff] }
  0xc5   :  { %579 = vmatpush.msrb.mxu1 %v533_v53  ;;  %619 = vmatpush.msrb.mxu3 %v534_v55 }
  0xc6   :  { %561 = vmatpush.msrb.mxu0 %v497_v44  ;;  %601 = vmatpush.msrb.mxu2 %v498_v45  ;;  %v646_v44 = vld [vmem:[#allocation2 + $0x870] sm:$0xff]  ;;  %v647_v45 = vld [vmem:[#allocation2 + $0x878] sm:$0xff] }
  0xc7   :  { %580 = vmatpush.msrb.mxu1 %v531_v57  ;;  %620 = vmatpush.msrb.mxu3 %v532_v59  ;;  %v678_v59 = vld [vmem:[#allocation2 + $0x970] sm:$0xff] }
  0xc8   :  { %562 = vmatpush.msrb.mxu0 %v495_v52  ;;  %602 = vmatpush.msrb.mxu2 %v496_v54 }
  0xc9   :  { %581 = vmatpush.msrb.mxu1 %v529_v61  ;;  %621 = vmatpush.msrb.mxu3 %v530_v63  ;;  %v679_v61 = vld [vmem:[#allocation2 + $0x978] sm:$0xff]  ;;  %v676_v63 = vld [vmem:[#allocation2 + $0x960] sm:$0xff] }
  0xca   :  { %563 = vmatpush.msrb.mxu0 %v493_v56  ;;  %603 = vmatpush.msrb.mxu2 %v494_v58  ;;  %v640_v58 = vld [vmem:[#allocation2 + $0x840] sm:$0xff] }
  0xcb   :  { %582 = vmatpush.msrb.mxu1 %v527_v1  ;;  %622 = vmatpush.msrb.mxu3 %v528_v3  ;;  %v677_v1 = vld [vmem:[#allocation2 + $0x968] sm:$0xff]  ;;  %v674_v3 = vld [vmem:[#allocation2 + $0x950] sm:$0xff] }
  0xcc   :  { %564 = vmatpush.msrb.mxu0 %v491_v60  ;;  %604 = vmatpush.msrb.mxu2 %v492_v62  ;;  %v641_v60 = vld [vmem:[#allocation2 + $0x848] sm:$0xff]  ;;  %v638_v62 = vld [vmem:[#allocation2 + $0x830] sm:$0xff] }
  0xcd   :  { %583 = vmatpush.msrb.mxu1 %v525_v5  ;;  %623 = vmatpush.msrb.mxu3 %v526_v7  ;;  %v675_v5 = vld [vmem:[#allocation2 + $0x958] sm:$0xff]  ;;  %v672_v7 = vld [vmem:[#allocation2 + $0x940] sm:$0xff] }
  0xce   :  { %565 = vmatpush.msrb.mxu0 %v489_v0  ;;  %605 = vmatpush.msrb.mxu2 %v490_v2  ;;  %v639_v0 = vld [vmem:[#allocation2 + $0x838] sm:$0xff]  ;;  %v636_v2 = vld [vmem:[#allocation2 + $0x820] sm:$0xff] }
  0xcf   :  { %584 = vmatpush.msrb.mxu1 %v523_v8  ;;  %624 = vmatpush.msrb.mxu3 %v524_v9  ;;  %v635_v8 = vld [vmem:[#allocation2 + $0x818] sm:$0xff]  ;;  %v673_v9 = vld [vmem:[#allocation2 + $0x948] sm:$0xff] }
  0xd0   :  { %566 = vmatpush.msrb.mxu0 %v487_v4  ;;  %606 = vmatpush.msrb.mxu2 %v488_v6  ;;  %v637_v4 = vld [vmem:[#allocation2 + $0x828] sm:$0xff]  ;;  %v634_v6 = vld [vmem:[#allocation2 + $0x810] sm:$0xff] }
  0xd1   :  { %585 = vmatpush.msrb.mxu1 %v521_v10  ;;  %625 = vmatpush.msrb.mxu3 %v522_v11  ;;  %v632_v10 = vld [vmem:[#allocation2 + $0x800] sm:$0xff]  ;;  %v670_v11 = vld [vmem:[#allocation2 + $0x930] sm:$0xff] }
  0xd3   :  { %586 = vmatpush.msrb.mxu1 %v519_v12  ;;  %626 = vmatpush.msrb.mxu3 %v520_v13  ;;  %v633_v12 = vld [vmem:[#allocation2 + $0x808] sm:$0xff]  ;;  %v671_v13 = vld [vmem:[#allocation2 + $0x938] sm:$0xff] }
 0x12d   :  { %v278_v46 = vpop.f32.mrf.mxu0 }
 0x130   :  { %v298_v47 = vpop.f32.mrf.mxu1 }
 0x131   :  { %v299_v48 = vadd.f32 %v298_v47, %v278_v46  ;;  %v680_v46 = vld [vmem:[#allocation2 + $0x980] sm:$0xff]  ;;  %v681_v47 = vld [vmem:[#allocation2 + $0x988] sm:$0xff] }
 0x133   :  { %422 = vmatmul.f32.vlgmr.msra.gmra.mxu0 %v299_v48  ;;  %462 = vmatmul.f32.vlgmr.msra.gmra.mxu2 %v299_v48  ;;  %v318_v49 = vpop.f32.mrf.mxu2  ;;  %v644_v48 = vld [vmem:[#allocation2 + $0x860] sm:$0xff] }
 0x134   :  { %696 = vmatpush.msra.mxu0 %v662_v14  ;;  %736 = vmatpush.msra.mxu2 %v663_v15  ;;  %v668_v14 = vld [vmem:[#allocation2 + $0x920] sm:$0xff]  ;;  %v669_v15 = vld [vmem:[#allocation2 + $0x928] sm:$0xff] }
 0x136   :  { %v338_v50 = vpop.f32.mrf.mxu3  ;;  %697 = vmatpush.msra.mxu0 %v660_v16  ;;  %737 = vmatpush.msra.mxu2 %v661_v17  ;;  %v666_v16 = vld [vmem:[#allocation2 + $0x910] sm:$0xff]  ;;  %v667_v17 = vld [vmem:[#allocation2 + $0x918] sm:$0xff] }
 0x137   :  { %v339_v51 = vadd.f32 %v338_v50, %v318_v49  ;;  %v645_v49 = vld [vmem:[#allocation2 + $0x868] sm:$0xff]  ;;  %v642_v50 = vld [vmem:[#allocation2 + $0x850] sm:$0xff] }
 0x138   :  { %698 = vmatpush.msra.mxu0 %v658_v18  ;;  %738 = vmatpush.msra.mxu2 %v659_v19  ;;  %v664_v18 = vld [vmem:[#allocation2 + $0x900] sm:$0xff]  ;;  %v665_v19 = vld [vmem:[#allocation2 + $0x908] sm:$0xff] }
 0x139   :  { %442 = vmatmul.f32.vlgmr.msra.gmra.mxu1 %v339_v51  ;;  %482 = vmatmul.f32.vlgmr.msra.gmra.mxu3 %v339_v51  ;;  %v643_v51 = vld [vmem:[#allocation2 + $0x858] sm:$0xff] }
 0x13a   :  { %716 = vmatpush.msra.mxu1 %v694_v20  ;;  %756 = vmatpush.msra.mxu3 %v695_v21  ;;  %v807_v20 = vld [vmem:[#allocation2 + $0xaf0] sm:$0xff]  ;;  %v808_v21 = vld [vmem:[#allocation2 + $0xaf8] sm:$0xff] }
 0x13b   :  { %699 = vmatpush.msra.mxu0 %v656_v23  ;;  %739 = vmatpush.msra.mxu2 %v657_v24  ;;  %v806_v23 = vld [vmem:[#allocation2 + $0xae8] sm:$0xff]  ;;  %v803_v24 = vld [vmem:[#allocation2 + $0xad0] sm:$0xff] }
 0x13c   :  { %717 = vmatpush.msra.mxu1 %v692_v22  ;;  %757 = vmatpush.msra.mxu3 %v693_v25  ;;  %v805_v22 = vld [vmem:[#allocation2 + $0xae0] sm:$0xff]  ;;  %v804_v25 = vld [vmem:[#allocation2 + $0xad8] sm:$0xff] }
 0x13d   :  { %700 = vmatpush.msra.mxu0 %v654_v28  ;;  %740 = vmatpush.msra.mxu2 %v655_v29  ;;  %v837_v28 = vld [vmem:[#allocation2 + $0xbe0] sm:$0xff] }
 0x13e   :  { %718 = vmatpush.msra.mxu1 %v690_v26  ;;  %758 = vmatpush.msra.mxu3 %v691_v27  ;;  %v839_v26 = vld [vmem:[#allocation2 + $0xbf0] sm:$0xff]  ;;  %v840_v27 = vld [vmem:[#allocation2 + $0xbf8] sm:$0xff]  ;;  %v801_v29 = vld [vmem:[#allocation2 + $0xac0] sm:$0xff] }
 0x13f   :  { %701 = vmatpush.msra.mxu0 %v652_v32  ;;  %741 = vmatpush.msra.mxu2 %v653_v33  ;;  %v835_v32 = vld [vmem:[#allocation2 + $0xbd0] sm:$0xff]  ;;  %v836_v33 = vld [vmem:[#allocation2 + $0xbd8] sm:$0xff] }
 0x140   :  { %719 = vmatpush.msra.mxu1 %v688_v30  ;;  %759 = vmatpush.msra.mxu3 %v689_v31  ;;  %v802_v30 = vld [vmem:[#allocation2 + $0xac8] sm:$0xff] }
 0x141   :  { %702 = vmatpush.msra.mxu0 %v650_v36  ;;  %742 = vmatpush.msra.mxu2 %v651_v37  ;;  %v838_v31 = vld [vmem:[#allocation2 + $0xbe8] sm:$0xff]  ;;  %v833_v36 = vld [vmem:[#allocation2 + $0xbc0] sm:$0xff] }
 0x142   :  { %720 = vmatpush.msra.mxu1 %v686_v34  ;;  %760 = vmatpush.msra.mxu3 %v687_v35  ;;  %v799_v34 = vld [vmem:[#allocation2 + $0xab0] sm:$0xff]  ;;  %v800_v35 = vld [vmem:[#allocation2 + $0xab8] sm:$0xff]  ;;  %v834_v37 = vld [vmem:[#allocation2 + $0xbc8] sm:$0xff] }
 0x143   :  { %703 = vmatpush.msra.mxu0 %v648_v40  ;;  %743 = vmatpush.msra.mxu2 %v649_v41  ;;  %v831_v40 = vld [vmem:[#allocation2 + $0xbb0] sm:$0xff]  ;;  %v832_v41 = vld [vmem:[#allocation2 + $0xbb8] sm:$0xff] }
 0x144   :  { %721 = vmatpush.msra.mxu1 %v684_v38  ;;  %761 = vmatpush.msra.mxu3 %v685_v39  ;;  %v797_v38 = vld [vmem:[#allocation2 + $0xaa0] sm:$0xff]  ;;  %v798_v39 = vld [vmem:[#allocation2 + $0xaa8] sm:$0xff] }
 0x145   :  { %704 = vmatpush.msra.mxu0 %v646_v44  ;;  %744 = vmatpush.msra.mxu2 %v647_v45  ;;  %v829_v44 = vld [vmem:[#allocation2 + $0xba0] sm:$0xff]  ;;  %v830_v45 = vld [vmem:[#allocation2 + $0xba8] sm:$0xff] }
 0x146   :  { %722 = vmatpush.msra.mxu1 %v682_v42  ;;  %762 = vmatpush.msra.mxu3 %v683_v43  ;;  %v795_v42 = vld [vmem:[#allocation2 + $0xa90] sm:$0xff]  ;;  %v796_v43 = vld [vmem:[#allocation2 + $0xa98] sm:$0xff] }
 0x147   :  { %705 = vmatpush.msra.mxu0 %v644_v48  ;;  %745 = vmatpush.msra.mxu2 %v645_v49  ;;  %v827_v48 = vld [vmem:[#allocation2 + $0xb90] sm:$0xff]  ;;  %v828_v49 = vld [vmem:[#allocation2 + $0xb98] sm:$0xff] }
 0x148   :  { %723 = vmatpush.msra.mxu1 %v680_v46  ;;  %763 = vmatpush.msra.mxu3 %v681_v47  ;;  %v793_v46 = vld [vmem:[#allocation2 + $0xa80] sm:$0xff]  ;;  %v794_v47 = vld [vmem:[#allocation2 + $0xa88] sm:$0xff] }
 0x149   :  { %706 = vmatpush.msra.mxu0 %v642_v50  ;;  %746 = vmatpush.msra.mxu2 %v643_v51  ;;  %v791_v50 = vld [vmem:[#allocation2 + $0xa70] sm:$0xff]  ;;  %v792_v51 = vld [vmem:[#allocation2 + $0xa78] sm:$0xff] }
 0x14a   :  { %724 = vmatpush.msra.mxu1 %v678_v59  ;;  %764 = vmatpush.msra.mxu3 %v679_v61 }
 0x14b   :  { %707 = vmatpush.msra.mxu0 %v640_v58  ;;  %747 = vmatpush.msra.mxu2 %v641_v60 }
 0x14c   :  { %725 = vmatpush.msra.mxu1 %v676_v63  ;;  %765 = vmatpush.msra.mxu3 %v677_v1  ;;  %v823_v1 = vld [vmem:[#allocation2 + $0xb70] sm:$0xff] }
 0x14d   :  { %708 = vmatpush.msra.mxu0 %v638_v62  ;;  %748 = vmatpush.msra.mxu2 %v639_v0  ;;  %v785_v0 = vld [vmem:[#allocation2 + $0xa40] sm:$0xff] }
 0x14e   :  { %726 = vmatpush.msra.mxu1 %v674_v3  ;;  %766 = vmatpush.msra.mxu3 %v675_v5  ;;  %v824_v3 = vld [vmem:[#allocation2 + $0xb78] sm:$0xff]  ;;  %v821_v5 = vld [vmem:[#allocation2 + $0xb60] sm:$0xff] }
 0x14f   :  { %709 = vmatpush.msra.mxu0 %v636_v2  ;;  %749 = vmatpush.msra.mxu2 %v637_v4  ;;  %v786_v2 = vld [vmem:[#allocation2 + $0xa48] sm:$0xff]  ;;  %v783_v4 = vld [vmem:[#allocation2 + $0xa30] sm:$0xff] }
 0x150   :  { %727 = vmatpush.msra.mxu1 %v672_v7  ;;  %767 = vmatpush.msra.mxu3 %v673_v9  ;;  %v822_v7 = vld [vmem:[#allocation2 + $0xb68] sm:$0xff]  ;;  %v819_v9 = vld [vmem:[#allocation2 + $0xb50] sm:$0xff] }
 0x151   :  { %710 = vmatpush.msra.mxu0 %v634_v6  ;;  %750 = vmatpush.msra.mxu2 %v635_v8  ;;  %v784_v6 = vld [vmem:[#allocation2 + $0xa38] sm:$0xff]  ;;  %v781_v8 = vld [vmem:[#allocation2 + $0xa20] sm:$0xff] }
 0x152   :  { %728 = vmatpush.msra.mxu1 %v670_v11  ;;  %768 = vmatpush.msra.mxu3 %v671_v13  ;;  %v820_v11 = vld [vmem:[#allocation2 + $0xb58] sm:$0xff]  ;;  %v817_v13 = vld [vmem:[#allocation2 + $0xb40] sm:$0xff] }
 0x153   :  { %711 = vmatpush.msra.mxu0 %v632_v10  ;;  %751 = vmatpush.msra.mxu2 %v633_v12  ;;  %v782_v10 = vld [vmem:[#allocation2 + $0xa28] sm:$0xff]  ;;  %v779_v12 = vld [vmem:[#allocation2 + $0xa10] sm:$0xff] }
 0x154   :  { %729 = vmatpush.msra.mxu1 %v668_v14  ;;  %769 = vmatpush.msra.mxu3 %v669_v15  ;;  %v780_v14 = vld [vmem:[#allocation2 + $0xa18] sm:$0xff]  ;;  %v818_v15 = vld [vmem:[#allocation2 + $0xb48] sm:$0xff] }
 0x156   :  { %730 = vmatpush.msra.mxu1 %v666_v16  ;;  %770 = vmatpush.msra.mxu3 %v667_v17  ;;  %v777_v16 = vld [vmem:[#allocation2 + $0xa00] sm:$0xff]  ;;  %v815_v17 = vld [vmem:[#allocation2 + $0xb30] sm:$0xff] }
 0x158   :  { %731 = vmatpush.msra.mxu1 %v664_v18  ;;  %771 = vmatpush.msra.mxu3 %v665_v19  ;;  %v778_v18 = vld [vmem:[#allocation2 + $0xa08] sm:$0xff]  ;;  %v816_v19 = vld [vmem:[#allocation2 + $0xb38] sm:$0xff] }
 0x1b0   :  { %v423_v52 = vpop.f32.mrf.mxu0 }
 0x1b6   :  { %v443_v53 = vpop.f32.mrf.mxu1  ;;  %v463_v55 = vpop.f32.mrf.mxu2 }
 0x1b7   :  { %v444_v54 = vadd.f32 %v443_v53, %v423_v52  ;;  %v825_v52 = vld [vmem:[#allocation2 + $0xb80] sm:$0xff]  ;;  %v826_v53 = vld [vmem:[#allocation2 + $0xb88] sm:$0xff] }
 0x1b9   :  { %567 = vmatmul.f32.vlgmr.msrb.gmra.mxu0 %v444_v54  ;;  %607 = vmatmul.f32.vlgmr.msrb.gmra.mxu2 %v444_v54  ;;  %v789_v54 = vld [vmem:[#allocation2 + $0xa60] sm:$0xff] }
 0x1ba   :  { %841 = vmatpush.msrb.mxu0 %v807_v20  ;;  %881 = vmatpush.msrb.mxu2 %v808_v21  ;;  %v813_v20 = vld [vmem:[#allocation2 + $0xb20] sm:$0xff]  ;;  %v814_v21 = vld [vmem:[#allocation2 + $0xb28] sm:$0xff] }
 0x1bc   :  { %v483_v56 = vpop.f32.mrf.mxu3  ;;  %842 = vmatpush.msrb.mxu0 %v805_v22  ;;  %882 = vmatpush.msrb.mxu2 %v806_v23  ;;  %v811_v22 = vld [vmem:[#allocation2 + $0xb10] sm:$0xff]  ;;  %v812_v23 = vld [vmem:[#allocation2 + $0xb18] sm:$0xff] }
 0x1bd   :  { %v484_v57 = vadd.f32 %v483_v56, %v463_v55  ;;  %v790_v55 = vld [vmem:[#allocation2 + $0xa68] sm:$0xff]  ;;  %v787_v56 = vld [vmem:[#allocation2 + $0xa50] sm:$0xff] }
 0x1be   :  { %843 = vmatpush.msrb.mxu0 %v803_v24  ;;  %883 = vmatpush.msrb.mxu2 %v804_v25  ;;  %v809_v24 = vld [vmem:[#allocation2 + $0xb00] sm:$0xff]  ;;  %v810_v25 = vld [vmem:[#allocation2 + $0xb08] sm:$0xff] }
 0x1bf   :  { %587 = vmatmul.f32.vlgmr.msrb.gmra.mxu1 %v484_v57  ;;  %627 = vmatmul.f32.vlgmr.msrb.gmra.mxu3 %v484_v57  ;;  %v788_v57 = vld [vmem:[#allocation2 + $0xa58] sm:$0xff] }
 0x1c0   :  { %861 = vmatpush.msrb.mxu1 %v839_v26  ;;  %901 = vmatpush.msrb.mxu3 %v840_v27 }
 0x1c1   :  { %844 = vmatpush.msrb.mxu0 %v801_v29  ;;  %884 = vmatpush.msrb.mxu2 %v802_v30 }
 0x1c2   :  { %862 = vmatpush.msrb.mxu1 %v837_v28  ;;  %902 = vmatpush.msrb.mxu3 %v838_v31 }
 0x1c3   :  { %845 = vmatpush.msrb.mxu0 %v799_v34  ;;  %885 = vmatpush.msrb.mxu2 %v800_v35 }
 0x1c4   :  { %863 = vmatpush.msrb.mxu1 %v835_v32  ;;  %903 = vmatpush.msrb.mxu3 %v836_v33 }
 0x1c5   :  { %846 = vmatpush.msrb.mxu0 %v797_v38  ;;  %886 = vmatpush.msrb.mxu2 %v798_v39 }
 0x1c6   :  { %864 = vmatpush.msrb.mxu1 %v833_v36  ;;  %904 = vmatpush.msrb.mxu3 %v834_v37 }
 0x1c7   :  { %847 = vmatpush.msrb.mxu0 %v795_v42  ;;  %887 = vmatpush.msrb.mxu2 %v796_v43 }
 0x1c8   :  { %865 = vmatpush.msrb.mxu1 %v831_v40  ;;  %905 = vmatpush.msrb.mxu3 %v832_v41 }
 0x1c9   :  { %848 = vmatpush.msrb.mxu0 %v793_v46  ;;  %888 = vmatpush.msrb.mxu2 %v794_v47 }
 0x1ca   :  { %866 = vmatpush.msrb.mxu1 %v829_v44  ;;  %906 = vmatpush.msrb.mxu3 %v830_v45 }
 0x1cb   :  { %849 = vmatpush.msrb.mxu0 %v791_v50  ;;  %889 = vmatpush.msrb.mxu2 %v792_v51 }
 0x1cc   :  { %867 = vmatpush.msrb.mxu1 %v827_v48  ;;  %907 = vmatpush.msrb.mxu3 %v828_v49 }
 0x1cd   :  { %850 = vmatpush.msrb.mxu0 %v789_v54  ;;  %890 = vmatpush.msrb.mxu2 %v790_v55 }
 0x1ce   :  { %868 = vmatpush.msrb.mxu1 %v825_v52  ;;  %908 = vmatpush.msrb.mxu3 %v826_v53 }
 0x1cf   :  { %851 = vmatpush.msrb.mxu0 %v787_v56  ;;  %891 = vmatpush.msrb.mxu2 %v788_v57 }
 0x1d0   :  { %869 = vmatpush.msrb.mxu1 %v823_v1  ;;  %909 = vmatpush.msrb.mxu3 %v824_v3 }
 0x1d1   :  { %852 = vmatpush.msrb.mxu0 %v785_v0  ;;  %892 = vmatpush.msrb.mxu2 %v786_v2 }
 0x1d2   :  { %870 = vmatpush.msrb.mxu1 %v821_v5  ;;  %910 = vmatpush.msrb.mxu3 %v822_v7 }
 0x1d3   :  { %853 = vmatpush.msrb.mxu0 %v783_v4  ;;  %893 = vmatpush.msrb.mxu2 %v784_v6 }
 0x1d4   :  { %871 = vmatpush.msrb.mxu1 %v819_v9  ;;  %911 = vmatpush.msrb.mxu3 %v820_v11 }
 0x1d5   :  { %854 = vmatpush.msrb.mxu0 %v781_v8  ;;  %894 = vmatpush.msrb.mxu2 %v782_v10 }
 0x1d6   :  { %872 = vmatpush.msrb.mxu1 %v817_v13  ;;  %912 = vmatpush.msrb.mxu3 %v818_v15 }
 0x1d7   :  { %855 = vmatpush.msrb.mxu0 %v779_v12  ;;  %895 = vmatpush.msrb.mxu2 %v780_v14 }
 0x1d8   :  { %873 = vmatpush.msrb.mxu1 %v815_v17  ;;  %913 = vmatpush.msrb.mxu3 %v816_v19 }
 0x1d9   :  { %856 = vmatpush.msrb.mxu0 %v777_v16  ;;  %896 = vmatpush.msrb.mxu2 %v778_v18 }
 0x1da   :  { %874 = vmatpush.msrb.mxu1 %v813_v20  ;;  %914 = vmatpush.msrb.mxu3 %v814_v21 }
 0x1dc   :  { %875 = vmatpush.msrb.mxu1 %v811_v22  ;;  %915 = vmatpush.msrb.mxu3 %v812_v23 }
 0x1de   :  { %876 = vmatpush.msrb.mxu1 %v809_v24  ;;  %916 = vmatpush.msrb.mxu3 %v810_v25 }
 0x236   :  { %v568_v58 = vpop.f32.mrf.mxu0 }
 0x23c   :  { %v588_v59 = vpop.f32.mrf.mxu1  ;;  %v608_v61 = vpop.f32.mrf.mxu2 }
 0x23d   :  { %v589_v60 = vadd.f32 %v588_v59, %v568_v58 }
 0x23f   :  { %712 = vmatmul.f32.vlgmr.msra.gmra.mxu0 %v589_v60  ;;  %752 = vmatmul.f32.vlgmr.msra.gmra.mxu2 %v589_v60 }
 0x242   :  { %v628_v62 = vpop.f32.mrf.mxu3 }
 0x243   :  { %v629_v63 = vadd.f32 %v628_v62, %v608_v61 }
 0x245   :  { %732 = vmatmul.f32.vlgmr.msra.gmra.mxu1 %v629_v63  ;;  %772 = vmatmul.f32.vlgmr.msra.gmra.mxu3 %v629_v63 }
 0x2bc   :  { %v713_v26 = vpop.f32.mrf.mxu0 }
 0x2c2   :  { %v733_v27 = vpop.f32.mrf.mxu1  ;;  %v753_v29 = vpop.f32.mrf.mxu2 }
 0x2c3   :  { %v734_v28 = vadd.f32 %v733_v27, %v713_v26 }
 0x2c5   :  { %857 = vmatmul.f32.vlgmr.msrb.gmra.mxu0 %v734_v28  ;;  %897 = vmatmul.f32.vlgmr.msrb.gmra.mxu2 %v734_v28 }
 0x2c8   :  { %v773_v30 = vpop.f32.mrf.mxu3 }
 0x2c9   :  { %v774_v31 = vadd.f32 %v773_v30, %v753_v29 }
 0x2cb   :  { %877 = vmatmul.f32.vlgmr.msrb.gmra.mxu1 %v774_v31  ;;  %917 = vmatmul.f32.vlgmr.msrb.gmra.mxu3 %v774_v31 }
 0x342   :  { %v858_v32 = vpop.f32.mrf.mxu0 }
 0x348   :  { %v878_v33 = vpop.f32.mrf.mxu1  ;;  %v898_v35 = vpop.f32.mrf.mxu2 }
 0x349   :  { %v879_v34 = vadd.f32 %v878_v33, %v858_v32 }
 0x34b   :  { %921 = vst [vmem:[#allocation7] sm:$0xff] %v879_v34 }
 0x34e   :  { %v918_v36 = vpop.f32.mrf.mxu3 }
 0x34f   :  { %v919_v37 = vadd.f32 %v918_v36, %v898_v35 }
 0x351   :  { %922 = vst [vmem:[#allocation7 + $0x8] sm:$0xff] %v919_v37 }
 0x352   :  { %933 = dma.vmem_to_hbm [thread:$0]  %s929_s1, 256, %s931_s23, [#allocation4]  }
 0x353   :  { %1022 = dma.done.wait [#allocation4], 256  }
 0x354   :  { %1023 = vsyncadd [#allocation4], 4294967040 }
 0x355   :  { %938 = vsyncpa [#allocation3], 1 }
 0x356   :  { %939 = vsyncpa [#allocation6], 1 }
 0x357   :  { %940 = vsyncpa [#allocation4], 1 }

</bundles_post_ra>
